<compile_context>
chip_gen: v7x
topology: tpu7x:2x2x1
jax: 0.10.0
libtpu: 0.0.40
codegen_flags: <defaults>
</compile_context>

<pallas_src>
import functools
import math

import numpy as np
import jax
import jax.numpy as jnp
from jax.experimental import pallas as pl
from jax.experimental.pallas import tpu as pltpu


# Target (output + lane-padded input) bytes per grid step.  Double-buffered by
# Pallas, so the default keeps resident VMEM well under v5e's 16 MiB default
# scoped limit while staying near the v6e/v7x per-step sweet spot.  On v6e/v7x
# callers may pass 6-8 MiB (and should raise vmem_limit_bytes if going higher).
_TARGET_BLOCK_BYTES = 4 << 20


def _sublane_multiple(dtype) -> int:
    itemsize = jnp.dtype(dtype).itemsize
    return max(8, 32 // max(1, itemsize))  # 8 for f32/i32, 16 for bf16, 32 for i8


def _pick_tile_rows(rows: int, out_row_bytes: int, in_row_bytes: int,
                    sub: int, block_bytes: int) -> int:
    """Rows per grid step, budgeting VMEM for output AND lane-padded input."""
    row_bytes = out_row_bytes + in_row_bytes
    tile = (block_bytes // max(1, row_bytes)) // sub * sub
    tile = max(tile, sub)
    if rows * out_row_bytes > (1 << 20):
        # Force >= 2 grid steps for non-tiny outputs: enables pipelining and
        # lets v7x split the "parallel" grid axis across its two TensorCores.
        half = ((rows + 1) // 2 + sub - 1) // sub * sub
        tile = min(tile, half)
    if tile >= rows:
        return rows  # single full block (block dim == full array dim is legal)
    return tile


@functools.lru_cache(maxsize=None)
def _dense_constants(r: int, num_types: int):
    """Cached replication matrix kron(I_R, 1_C) (bf16) and class-per-lane row."""
    lanes = r * num_types
    rep = jnp.asarray(np.repeat(np.eye(r, dtype=np.float32), num_types, axis=1),
                      dtype=jnp.bfloat16)                       # (r, lanes), 0/1
    classes = jnp.asarray((np.arange(lanes) % num_types)[None, :],
                          dtype=jnp.float32)                    # (1, lanes)
    return rep, classes


def _one_hot_dense_kernel(types_ref, rep_ref, classes_ref, out_ref):
    # types_ref  : (TR, R)  int   -- R atoms per lane-dense output row
    # rep_ref    : (R, L)   bf16  -- kron(I_R, ones(1, C)) replication matrix
    # classes_ref: (1, L)   f32   -- class index of each lane (iota(L) % C)
    # out_ref    : (TR, L)        -- lane-dense one-hot slab
    # int -> int32 -> bf16 keeps narrow-int inputs on well-supported casts;
    # ids <= 256 are exact in bf16 and each output column has exactly one
    # nonzero product, so the f32 accumulation is exact.
    t = types_ref[...].astype(jnp.int32).astype(jnp.bfloat16)
    t_rep = jnp.dot(t, rep_ref[...], preferred_element_type=jnp.float32)
    eq = t_rep == classes_ref[...]
    out_ref[...] = jnp.where(eq, jnp.asarray(1, out_ref.dtype),
                             jnp.asarray(0, out_ref.dtype))


def _one_hot_simple_kernel(types_ref, out_ref):
    # types_ref: (TN, 1) int ; out_ref: (TN, num_types)
    t = types_ref[...].astype(jnp.int32)
    classes = jax.lax.broadcasted_iota(jnp.int32, out_ref.shape, 1)
    eq = t == classes
    out_ref[...] = jnp.where(eq, jnp.asarray(1, out_ref.dtype),
                             jnp.asarray(0, out_ref.dtype))


def _one_hot_dense(types, num_types, out_dtype, block_bytes):
    n = types.shape[0]
    r = 128 // math.gcd(num_types, 128)   # atoms per lane-dense row (<= 128)
    lanes = r * num_types                 # multiple of 128

    rows = pl.cdiv(n, r)
    n_pad = rows * r
    if n_pad != n:
        # Out-of-range sentinel -> all-zero rows for the padded atoms.
        pad_val = -1 if jnp.issubdtype(types.dtype, jnp.signedinteger) else num_types
        types = jnp.pad(types, (0, n_pad - n), constant_values=pad_val)
    types2d = types.reshape(rows, r)

    rep, classes = _dense_constants(r, num_types)

    sub = max(_sublane_multiple(out_dtype), _sublane_multiple(types.dtype))
    out_row_bytes = lanes * jnp.dtype(out_dtype).itemsize
    in_row_bytes = 128 * jnp.dtype(types.dtype).itemsize  # r <= 128 lanes, padded
    tile_rows = _pick_tile_rows(rows, out_row_bytes, in_row_bytes, sub, block_bytes)
    grid = (pl.cdiv(rows, tile_rows),)

    slab = pl.pallas_call(
        _one_hot_dense_kernel,
        out_shape=jax.ShapeDtypeStruct((rows, lanes), out_dtype),
        grid=grid,
        in_specs=[
            pl.BlockSpec((tile_rows, r), lambda i: (i, 0)),
            pl.BlockSpec((r, lanes), lambda i: (0, 0)),   # constant index: resident
            pl.BlockSpec((1, lanes), lambda i: (0, 0)),   # constant index: resident
        ],
        out_specs=pl.BlockSpec((tile_rows, lanes), lambda i: (i, 0)),
        compiler_params=pltpu.CompilerParams(
            dimension_semantics=("parallel",)),
    )(types2d, rep, classes)

    one_hot = slab.reshape(n_pad, num_types)  # same row-major bytes: free
    if n_pad != n:
        # TODO(synk): extra read+write pass over the output unless fused into
        # the consumer (jit) or N is padded to a multiple of r by the caller.
        one_hot = one_hot[:n]
    return one_hot


def _one_hot_simple(types, num_types, out_dtype, block_bytes):
    n = types.shape[0]
    types2d = types.reshape(n, 1)
    sub = max(_sublane_multiple(out_dtype), _sublane_multiple(types.dtype))
    out_row_bytes = pl.cdiv(num_types, 128) * 128 * jnp.dtype(out_dtype).itemsize
    in_row_bytes = 128 * jnp.dtype(types.dtype).itemsize
    tile_n = _pick_tile_rows(n, out_row_bytes, in_row_bytes, sub, block_bytes)
    grid = (pl.cdiv(n, tile_n),)
    return pl.pallas_call(
        _one_hot_simple_kernel,
        out_shape=jax.ShapeDtypeStruct((n, num_types), out_dtype),
        grid=grid,
        in_specs=[pl.BlockSpec((tile_n, 1), lambda i: (i, 0))],
        out_specs=pl.BlockSpec((tile_n, num_types), lambda i: (i, 0)),
        compiler_params=pltpu.CompilerParams(
            dimension_semantics=("parallel",)),
    )(types2d)


def one_hot_atom_encoding(atom_types, positions, num_types, set_features=True,
                          out_dtype=None, block_bytes=_TARGET_BLOCK_BYTES):
    """Pallas equivalent of OneHotAtomEncoding.forward (universal=False).

    Args:
      atom_types: integer array [N, 1] (ATOM_TYPE_KEY); squeezed internally.
        int8/int16 ids are accepted end-to-end (cast happens in-kernel).
      positions:  float array [N, 3] (POSITIONS_KEY) — only its dtype is used.
      num_types:  number of discrete atom types.
      set_features: if True also return the encoding as node_features.
      out_dtype:  output dtype; defaults to positions.dtype.  Pass bf16 if the
        consumer is bf16 — it halves the dominant HBM write traffic.
      block_bytes: target (output + input) bytes per grid step.  Default 4 MiB
        is safe on every generation; v6e/v7x may use 6-8 MiB.

    Returns:
      dict with "node_attrs" (and "node_features") of shape [N, num_types].
      Out-of-range type ids give all-zero rows (torch would raise).
    """
    types = atom_types.reshape(-1)
    if (not jnp.issubdtype(types.dtype, jnp.integer)
            or jnp.dtype(types.dtype).itemsize > 4):
        types = types.astype(jnp.int32)
    out_dtype = jnp.dtype(positions.dtype if out_dtype is None else out_dtype)

    r = 128 // math.gcd(num_types, 128)
    lanes = r * num_types
    if r > 1 and lanes <= 1024 and num_types <= 256:
        one_hot = _one_hot_dense(types, num_types, out_dtype, block_bytes)
    else:
        # num_types is already a multiple of 128 (lane-dense as-is), too large
        # for exact bf16 replication, or the dense row would be unreasonably
        # wide -> simple per-atom-row kernel.
        one_hot = _one_hot_simple(types, num_types, out_dtype, block_bytes)

    data = {"node_attrs": one_hot}
    if set_features:
        data["node_features"] = one_hot
    return data


if __name__ == "__main__":
    key = jax.random.PRNGKey(0)

    def check(n_atoms, num_types, pos_dtype=jnp.float32, *, out_dtype=None,
              types_dtype=jnp.int32, block_bytes=_TARGET_BLOCK_BYTES, seed=0):
        k_t, k_p = jax.random.split(jax.random.fold_in(key, seed))
        atom_types = jax.random.randint(k_t, (n_atoms, 1), 0, num_types,
                                        dtype=jnp.int32).astype(types_dtype)
        positions = jax.random.normal(k_p, (n_atoms, 3),
                                      dtype=jnp.float32).astype(pos_dtype)
        out = one_hot_atom_encoding(atom_types, positions, num_types,
                                    set_features=True, out_dtype=out_dtype,
                                    block_bytes=block_bytes)
        got = jax.block_until_ready(out["node_attrs"])
        want_dtype = jnp.dtype(pos_dtype if out_dtype is None else out_dtype)
        ref = jax.nn.one_hot(atom_types[:, 0].astype(jnp.int32), num_types,
                             dtype=want_dtype)
        assert got.shape == (n_atoms, num_types), (got.shape, n_atoms, num_types)
        assert got.dtype == want_dtype, (got.dtype, want_dtype)
        assert jnp.array_equal(got, ref), (n_atoms, num_types, str(want_dtype))
        assert out["node_features"] is out["node_attrs"]

    # Module-sized example: 16 atoms, 4 atom types, float32 positions.
    check(16, 4, seed=0)
    # Lane-dense path with a ragged tail (n not a multiple of R=32).
    check(50, 4, seed=1)
    # Multi-step grid with a ragged tail block (tiny block_bytes forces it).
    check(1100, 4, block_bytes=4096, seed=2)
    # Non-power-of-two num_types on the lane-dense path (L = 384).
    check(300, 3, seed=3)
    # Fallback path: num_types already a multiple of 128.
    check(24, 128, seed=4)
    # bfloat16 positions -> bfloat16 one-hot.
    check(64, 4, jnp.bfloat16, seed=5)
    # Explicit bf16 output with f32 positions (halves HBM write traffic).
    check(48, 4, out_dtype=jnp.bfloat16, seed=6)
    # Narrow int8 type ids end-to-end (cast in-kernel), odd num_types.
    check(40, 5, types_dtype=jnp.int8, seed=7)
    # >1 MiB output: exercises the forced >=2 grid steps (pipelining/megacore).
    check(70000, 4, seed=8)

    print("KERNEL_OK")
</pallas_src>

<mosaic_0001>
module attributes {stable_mosaic.version = 11 : i64} {
  func.func @_one_hot_dense_kernel(%arg0: i32, %arg1: memref<1x32xi32, #tpu.memory_space<vmem>>, %arg2: memref<32x128xbf16, #tpu.memory_space<vmem>>, %arg3: memref<1x128xf32, #tpu.memory_space<vmem>>, %arg4: memref<1x128xf32, #tpu.memory_space<vmem>>) attributes {dimension_semantics = [#tpu.dimension_semantics<parallel>], iteration_bounds = array<i64: 1>, scalar_prefetch = 0 : i64, scratch_operands = 0 : i64, tpu.core_type = #tpu.core_type<tc>, window_params = [{transform_indices = @transform_0, window_bounds = array<i64: 1, 32>}, {pipeline_mode = #tpu.pipeline_mode<synchronous>, transform_indices = @transform_1, window_bounds = array<i64: 32, 128>}, {pipeline_mode = #tpu.pipeline_mode<synchronous>, transform_indices = @transform_2, window_bounds = array<i64: 1, 128>}, {transform_indices = @transform_3, window_bounds = array<i64: 1, 128>}]} {
    %c0 = arith.constant 0 : index
    %c0_0 = arith.constant 0 : index
    %0 = vector.load %arg1[%c0, %c0_0] : memref<1x32xi32, #tpu.memory_space<vmem>>, vector<1x32xi32>
    %1 = arith.sitofp %0 : vector<1x32xi32> to vector<1x32xbf16>
    %c0_1 = arith.constant 0 : index
    %c0_2 = arith.constant 0 : index
    %2 = vector.load %arg2[%c0_1, %c0_2] : memref<32x128xbf16, #tpu.memory_space<vmem>>, vector<32x128xbf16>
    %cst = arith.constant dense<0.000000e+00> : vector<1x128xf32>
    %3 = tpu.matmul %1, %2, %cst {dimension_numbers = #tpu.dot_dimension_numbers<[1], [0], [0], [1], [0, 0, 1, 1], [], []>} : vector<1x32xbf16>, vector<32x128xbf16>, vector<1x128xf32> -> vector<1x128xf32>
    %c0_3 = arith.constant 0 : index
    %c0_4 = arith.constant 0 : index
    %4 = vector.load %arg3[%c0_3, %c0_4] : memref<1x128xf32, #tpu.memory_space<vmem>>, vector<1x128xf32>
    %5 = arith.cmpf oeq, %3, %4 : vector<1x128xf32>
    %cst_5 = arith.constant 1.000000e+00 : f32
    %cst_6 = arith.constant 0.000000e+00 : f32
    %6 = vector.broadcast %cst_5 : f32 to vector<1x128xf32>
    %7 = vector.broadcast %cst_6 : f32 to vector<1x128xf32>
    %8 = arith.select %5, %6, %7 : vector<1x128xi1>, vector<1x128xf32>
    %c0_7 = arith.constant 0 : index
    %c0_8 = arith.constant 0 : index
    %9 = vector.load %arg4[%c0_7, %c0_8] : memref<1x128xf32, #tpu.memory_space<vmem>>, vector<1x128xf32>
    tpu.vector_store %arg4[%c0_7, %c0_8], %8 {strides = array<i32>} : memref<1x128xf32, #tpu.memory_space<vmem>>, vector<1x128xf32>,
    return
  }
  func.func @transform_0(%arg0: i32) -> (i32, i32) {
    %c0_i32 = arith.constant 0 : i32
    %c0_i32_0 = arith.constant 0 : i32
    return %arg0, %c0_i32 : i32, i32
  }
  func.func @transform_1(%arg0: i32) -> (i32, i32) {
    %c0_i32 = arith.constant 0 : i32
    %c0_i32_0 = arith.constant 0 : i32
    %c0_i32_1 = arith.constant 0 : i32
    return %c0_i32, %c0_i32_0 : i32, i32
  }
  func.func @transform_2(%arg0: i32) -> (i32, i32) {
    %c0_i32 = arith.constant 0 : i32
    %c0_i32_0 = arith.constant 0 : i32
    %c0_i32_1 = arith.constant 0 : i32
    return %c0_i32, %c0_i32_0 : i32, i32
  }
  func.func @transform_3(%arg0: i32) -> (i32, i32) {
    %c0_i32 = arith.constant 0 : i32
    %c0_i32_0 = arith.constant 0 : i32
    return %arg0, %c0_i32 : i32, i32
  }
}

</mosaic_0001>

<bundles_post_ra>
// kernel: tpu_custom_call.1
= control target key start
LH: loop header
LB: loop body
LE: loop exit
PB: predicated region body
PF: predicated region fallthrough
CT: control target
= control target key end

     0   :  { %8 = vsyncpa [#allocation3], 0  ;;  %s293_s0 = inlined_call_operand.hbm [shape: s32[1,32], index: 0, kind: input, shape index: {}]   ;;  %s294_s1 = inlined_call_operand.hbm [shape: bf16[32,128], index: 1, kind: input, shape index: {}]   ;;  %s295_s2 = inlined_call_operand.vmem [shape: f32[1,128], index: 2, kind: input, shape index: {}]   ;;  %s296_s3 = inlined_call_operand.hbm [shape: f32[1,128], index: 3, kind: output, shape index: {}]  }
   0x1   :  { %9 = vsyncpa [#allocation6], 0 }
   0x2   :  { %10 = vsyncpa [#allocation4], 0  ;;  %s220_s12 = smov [#allocation2]   ;;  %s221_s14 = smov [#allocation5]  }
   0x3   :  { %s17_s13 = sshll.u32 %s220_s12, 4  ;;  %s26_s15 = sshll.u32 %s221_s14, 4  ;;  %s18_s13 = int_to_ptr.vmem [resolvable:$true] %s17_s13  ;;  %s247_s15 = int_to_ptr.vmem [resolvable:$true] %s26_s15 }
   0x4   :  { %s148_s18 = scalar_lea.hbm %s293_s0, 16 }
   0x5   :  { %p149_p0 = scmp.ne.s32.totalorder %s293_s0, %s148_s18  ;;  %p152_p1 = scmp.lt.u32.totalorder %s148_s18, %s293_s0 }
   0x7   :  { %p154_p2 = pnand %p152_p1, %p149_p0 }
   0x9   :  { %157 = shalt.err (!%p154_p2)
}
   0xa   :  { %s158_s23 = scalar_lea.vmem %s18_s13, 16  ;;  %s162_s24 = scalar_lea.vmem %s18_s13, 32 }
   0xb   :  { %p159_p3 = scmp.ne.s32.totalorder %s18_s13, %s158_s23  ;;  %p163_p4 = scmp.lt.s32.totalorder %s18_s13, %s18_s13 }
   0xc   :  { %p164_p5 = scmp.lt.s32.totalorder %s162_s24, %s158_s23 }
   0xe   :  { %p165_p6 = por %p164_p5, %p163_p4 }
  0x10   :  { %p166_p7 = pnand %p165_p6, %p159_p3 }
  0x12   :  { %169 = shalt.err (!%p166_p7)
}
  0x13   :  { %20 = dma.hbm_to_vmem [thread:$0]  %s293_s0, 16, %s18_s13, [#allocation3]  }
  0x14   :  { %s170_s29 = scalar_lea.hbm %s294_s1, 256 }
  0x15   :  { %p171_p8 = scmp.ne.s32.totalorder %s294_s1, %s170_s29  ;;  %p174_p9 = scmp.lt.u32.totalorder %s170_s29, %s294_s1 }
  0x17   :  { %p176_p10 = pnand %p174_p9, %p171_p8 }
  0x19   :  { %179 = shalt.err (!%p176_p10)
}
  0x1a   :  { %s180_s7 = scalar_lea.vmem %s247_s15, 256  ;;  %p185_p12 = scmp.lt.s32.totalorder %s247_s15, %s247_s15 }
  0x1b   :  { %p181_p11 = scmp.ne.s32.totalorder %s247_s15, %s180_s7  ;;  %p186_p13 = scmp.lt.s32.totalorder %s180_s7, %s180_s7 }
  0x1d   :  { %p187_p0 = por %p186_p13, %p185_p12 }
  0x1f   :  { %p188_p1 = pnand %p187_p0, %p181_p11 }
  0x21   :  { %191 = shalt.err (!%p188_p1)
}
  0x22   :  { %s222_s0 = smov 64   ;;  %s223_s8 = smov 4  }
  0x23   :  { %32 = dma.hbm_to_vmem [thread:$0]  %s294_s1, 256, %s247_s15, [#allocation6], %s222_s0, %s222_s0, %s223_s8  }
  0x24   :  { %214 = dma.done.wait [#allocation3], 16  }
  0x25   :  { %215 = vsyncadd [#allocation3], 4294967280 }
  0x26   :  { %216 = dma.done.wait [#allocation6], 256  }
  0x27   :  { %217 = vsyncadd [#allocation6], 4294967040  ;;  %v224_v0 = vmov 0.0   ;;  %vm225_vm0 = vmmov 0   ;;  %v146_v1 = vld [vmem:[#allocation5] sm:$0xff]   ;;  %v147_v2 = vld [vmem:[#allocation5 + $0x8] sm:$0xff]  }
  0x28   :  { %131 = vmatprep.subr.bf16.mxu0 %v224_v0  ;;  %135 = vmatprep.mubr.msk.bf16.mxu0 %vm225_vm0, %v224_v0  ;;  %v42_v3 = vld [vmem:[#allocation2] sm:$0x1]  ;;  %vm61_vm1 = vcmask 261120   ;;  %s226_s12 = smov [#allocation7]  }
  0x29   :  { %132 = vmatpush3.bf16.msra.mxu0 %v146_v1  ;;  %v43_v4 = vcvt.s32.f32 %v42_v3  ;;  %v105_v6 = vld [vmem:[%s295_s2] sm:$0x1]  ;;  %s115_s13 = sshll.u32 %s226_s12, 4  ;;  %s116_s13 = int_to_ptr.vmem [resolvable:$true] %s115_s13 }
  0x2a   :  { %133 = vmatprep.subr.bf16.mxu0 %v224_v0  ;;  %s192_s14 = scalar_lea.vmem %s116_s13, 16  ;;  %s196_s15 = scalar_lea.vmem %s116_s13, 32 }
  0x2b   :  { %v44_v5 = vpack.c.bf16 %v43_v4, %v43_v4  ;;  %p193_p2 = scmp.ne.s32.totalorder %s116_s13, %s192_s14  ;;  %p197_p3 = scmp.lt.s32.totalorder %s116_s13, %s116_s13 }
  0x2c   :  { %p198_p4 = scmp.lt.s32.totalorder %s196_s15, %s192_s14 }
  0x2d   :  { %134 = vmatpush3.bf16.msra.mxu0 %v147_v2 }
  0x2e   :  { %p199_p5 = por %p198_p4, %p197_p3 }
  0x30   :  { %136 = vmatmul.mubr.msk.bf16.vlgmr.msra.gmra.mrb[0].mxu0 %vm61_vm1, %v44_v5  ;;  %p200_p6 = pnand %p199_p5, %p193_p2 }
 0x103   :  { %v99_v7 = vpop.f32.mrb[0].mxu0 }
 0x104   :  { %vm106_vm2 = vcmp.eq.f32.partialorder %v99_v7, %v105_v6  ;;  %v137_v8 = vpop.f32.mrb[1].mxu0 }
 0x105   :  { %v107_v9 = vsel %vm106_vm2, 1.0, %v224_v0  ;;  %v102_v10 = vpop.f32.mrb[2].mxu0 }
 0x106   :  { %108 = vst [vmem:[#allocation7] sm:$0x1] %v107_v9  ;;  %v138_v11 = vpop.f32.mrb[3].mxu0 }
 0x107   :  { %203 = shalt.err (!%p200_p6)
}
 0x108   :  { %s204_s17 = scalar_lea.hbm %s296_s3, 16 }
 0x109   :  { %p205_p7 = scmp.ne.s32.totalorder %s296_s3, %s204_s17  ;;  %p208_p8 = scmp.lt.u32.totalorder %s204_s17, %s296_s3 }
 0x10b   :  { %p210_p9 = pnand %p208_p8, %p205_p7 }
 0x10d   :  { %213 = shalt.err (!%p210_p9)
}
 0x10e   :  { %118 = dma.vmem_to_hbm [thread:$0]  %s116_s13, 16, %s296_s3, [#allocation4]  }
 0x10f   :  { %218 = dma.done.wait [#allocation4], 16  }
 0x110   :  { %219 = vsyncadd [#allocation4], 4294967280 }
 0x111   :  { %122 = vsyncpa [#allocation3], 1 }
 0x112   :  { %123 = vsyncpa [#allocation6], 1 }
 0x113   :  { %124 = vsyncpa [#allocation4], 1 }

</bundles_post_ra>
